<compile_context>
chip_gen: v6e
topology: v6e:2x2x1
jax: 0.10.0
libtpu: 0.0.40
codegen_flags: <defaults>
</compile_context>

<pallas_src>
import jax
import jax.numpy as jnp
from jax.experimental import pallas as pl
from jax.experimental.pallas import tpu as pltpu

# --- toy configuration (small stand-ins for CLIP ViT-B/16 sizes) -----------
B = 2                         # batch
C = 3                         # image channels (CLIP pixel_values are RGB)
IMG = 16                      # image spatial size
PATCH = 8                     # patch size -> Np = (IMG // PATCH)**2 = 4
NP = (IMG // PATCH) ** 2
DPATCH = C * PATCH * PATCH    # flattened patch dim = 192
HV = 128                      # vision tower hidden width (toy)
HT = 128                      # text tower hidden width (toy)
P = 128                       # projection_dim (toy stand-in for 512)
VOCAB = 64                    # toy vocab
SEQ = 8                       # text sequence length
LANE = 128


def clip_regressor_kernel(img_ref, txt_ref, v_img_ref, v_txt_ref, b_ref,
                          out_ref):
    """Regression head on folded weights: VPU multiply + lane reduce only."""
    img_c = jnp.sum(img_ref[...] * v_img_ref[...], axis=-1, keepdims=True)
    txt_c = jnp.sum(txt_ref[...] * v_txt_ref[...], axis=-1, keepdims=True)
    score = img_c + txt_c + b_ref[0]                              # [B, 1]
    # lane-dense store (scalar broadcast across 128 lanes); wrapper takes col 0
    out_ref[...] = jnp.broadcast_to(score, out_ref.shape)


def fold_params(params):
    """One-time fold of the frozen linear chain. Call once, NOT per forward."""
    hi = jax.lax.Precision.HIGHEST
    proj = params["w_reg"].shape[0] // 2
    # vision: patch-embed -> visual_projection -> head column, all frozen
    v_img = jnp.dot(jnp.dot(params["w_patch"], params["w_vproj"], precision=hi),
                    params["w_reg"][:proj], precision=hi)          # [DPATCH, 1]
    # text: text_projection -> head column
    v_txt = jnp.dot(params["w_tproj"], params["w_reg"][proj:],
                    precision=hi)                                  # [HT, 1]
    return {
        "v_img": v_img.reshape(1, DPATCH).astype(jnp.float32),    # [1, DPATCH]
        "v_txt": v_txt.reshape(1, HT).astype(jnp.float32),        # [1, HT]
        "b_reg": params["b_reg"].astype(jnp.float32),             # [1]
        "tok_emb": params["tok_emb"],                              # HBM-side table
    }


@jax.jit
def clip_regressor(pixel_values, input_ids, folded):
    """pixel_values: f32[B, C, H, W] (NCHW); input_ids: i32[B, SEQ]."""
    b, c, h, w = pixel_values.shape
    nph, npw = h // PATCH, w // PATCH
    n_patches = nph * npw

    # commute mean-pool with the linear patch-embed+projection: pool the
    # flattened patch pixels to [B, DPATCH] before any weights touch them.
    pooled_img = (
        pixel_values.reshape(b, c, nph, PATCH, npw, PATCH)
        .transpose(0, 1, 3, 5, 2, 4)                   # (b, c, ph, pw, gi, gj)
        .reshape(b, c * PATCH * PATCH, n_patches)
        .mean(axis=-1)
        .astype(jnp.float32))                                      # [B, DPATCH]

    # text path: token-embedding gather stays outside the kernel; mean pool.
    tok = jnp.take(folded["tok_emb"], input_ids, axis=0)           # [B, SEQ, HT]
    pooled_txt = tok.mean(axis=1).astype(jnp.float32)              # [B, HT]

    vmem = pl.BlockSpec(memory_space=pltpu.MemorySpace.VMEM)
    smem = pl.BlockSpec(memory_space=pltpu.MemorySpace.SMEM)

    out = pl.pallas_call(
        clip_regressor_kernel,
        out_shape=jax.ShapeDtypeStruct((b, LANE), jnp.float32),
        in_specs=[vmem, vmem, vmem, vmem, smem],
        out_specs=vmem,
    )(pooled_img, pooled_txt, folded["v_img"], folded["v_txt"],
      folded["b_reg"])

    # regression scalar is broadcast across the 128 lanes; take column 0
    return out[:, :1]


def clip_regressor_reference(pixel_values, input_ids, params):
    """Pure-JAX reference of the same (reduced) forward, fully unfolded."""
    b, c, h, w = pixel_values.shape
    nph, npw = h // PATCH, w // PATCH
    n_patches = nph * npw
    hi = jax.lax.Precision.HIGHEST

    patches = pixel_values.reshape(b, c, nph, PATCH, npw, PATCH)
    patches = patches.transpose(0, 2, 4, 1, 3, 5).reshape(
        b, n_patches, c * PATCH * PATCH).astype(jnp.float32)
    patch_emb = jnp.dot(patches, params["w_patch"], precision=hi)   # [B,Np,HV]
    img_pooled = patch_emb.mean(axis=1)                             # [B,HV]
    image_embeds = jnp.dot(img_pooled, params["w_vproj"], precision=hi)

    tok = jnp.take(params["tok_emb"], input_ids, axis=0)
    txt_pooled = tok.mean(axis=1).astype(jnp.float32)
    text_embeds = jnp.dot(txt_pooled, params["w_tproj"], precision=hi)

    features = jnp.concatenate([image_embeds, text_embeds], axis=1)
    return jnp.dot(features, params["w_reg"], precision=hi) + params["b_reg"]


def init_params(key):
    ks = jax.random.split(key, 6)
    scale = 0.02
    return {
        "w_patch": scale * jax.random.normal(ks[0], (DPATCH, HV), jnp.float32),
        "tok_emb": scale * jax.random.normal(ks[1], (VOCAB, HT), jnp.float32),
        "w_vproj": scale * jax.random.normal(ks[2], (HV, P), jnp.float32),
        "w_tproj": scale * jax.random.normal(ks[3], (HT, P), jnp.float32),
        # nn.Linear(2P, 1): weight [1, 2P] stored transposed as [2P, 1], bias [1]
        "w_reg": scale * jax.random.normal(ks[4], (2 * P, 1), jnp.float32),
        "b_reg": scale * jax.random.normal(ks[5], (1,), jnp.float32),
    }


if __name__ == "__main__":
    key = jax.random.PRNGKey(0)
    k_img, k_txt, k_par = jax.random.split(key, 3)

    pixel_values = jax.random.normal(k_img, (B, C, IMG, IMG), jnp.float32)
    input_ids = jax.random.randint(k_txt, (B, SEQ), 0, VOCAB, jnp.int32)
    params = init_params(k_par)

    # one-time weight fold (hoisted out of the per-call path)
    folded = jax.block_until_ready(fold_params(params))

    out = clip_regressor(pixel_values, input_ids, folded)
    out = jax.block_until_ready(out)
    assert out.shape == (B, 1) and out.dtype == jnp.float32

    ref = clip_regressor_reference(pixel_values, input_ids, params)
    assert jnp.allclose(out, ref, atol=1e-3, rtol=1e-3)

    print("KERNEL_OK")
</pallas_src>

<mosaic_0001>
module attributes {stable_mosaic.version = 11 : i64} {
  func.func @clip_regressor_kernel(%arg0: memref<2x192xf32, #tpu.memory_space<vmem>>, %arg1: memref<2x128xf32, #tpu.memory_space<vmem>>, %arg2: memref<1x192xf32, #tpu.memory_space<vmem>>, %arg3: memref<1x128xf32, #tpu.memory_space<vmem>>, %arg4: memref<1xf32, #tpu.memory_space<smem>>, %arg5: memref<2x128xf32, #tpu.memory_space<vmem>>) attributes {dimension_semantics = [], scalar_prefetch = 0 : i64, scratch_operands = 0 : i64, tpu.core_type = #tpu.core_type<tc>} {
    %c0 = arith.constant 0 : index
    %c0_0 = arith.constant 0 : index
    %0 = vector.load %arg0[%c0, %c0_0] : memref<2x192xf32, #tpu.memory_space<vmem>>, vector<2x192xf32>
    %c0_1 = arith.constant 0 : index
    %c0_2 = arith.constant 0 : index
    %1 = vector.load %arg2[%c0_1, %c0_2] : memref<1x192xf32, #tpu.memory_space<vmem>>, vector<1x192xf32>
    %2 = vector.broadcast %1 : vector<1x192xf32> to vector<2x192xf32>
    %3 = arith.mulf %0, %2 : vector<2x192xf32>
    %cst = arith.constant dense<0.000000e+00> : vector<2xf32>
    %4 = vector.multi_reduction <add>, %3, %cst [1] : vector<2x192xf32> to vector<2xf32>
    %5 = vector.shape_cast %4 : vector<2xf32> to vector<2x1xf32>
    %c0_3 = arith.constant 0 : index
    %c0_4 = arith.constant 0 : index
    %6 = vector.load %arg1[%c0_3, %c0_4] : memref<2x128xf32, #tpu.memory_space<vmem>>, vector<2x128xf32>
    %c0_5 = arith.constant 0 : index
    %c0_6 = arith.constant 0 : index
    %7 = vector.load %arg3[%c0_5, %c0_6] : memref<1x128xf32, #tpu.memory_space<vmem>>, vector<1x128xf32>
    %8 = vector.broadcast %7 : vector<1x128xf32> to vector<2x128xf32>
    %9 = arith.mulf %6, %8 : vector<2x128xf32>
    %cst_7 = arith.constant dense<0.000000e+00> : vector<2xf32>
    %10 = vector.multi_reduction <add>, %9, %cst_7 [1] : vector<2x128xf32> to vector<2xf32>
    %11 = vector.shape_cast %10 : vector<2xf32> to vector<2x1xf32>
    %12 = arith.addf %5, %11 : vector<2x1xf32>
    %c0_8 = arith.constant 0 : index
    %13 = memref.load %arg4[%c0_8] : memref<1xf32, #tpu.memory_space<smem>>
    %14 = vector.broadcast %13 : f32 to vector<2x1xf32>
    %15 = arith.addf %12, %14 : vector<2x1xf32>
    %16 = vector.shape_cast %15 : vector<2x1xf32> to vector<2x1xf32>
    %17 = vector.broadcast %16 : vector<2x1xf32> to vector<2x128xf32>
    %c0_9 = arith.constant 0 : index
    %c0_10 = arith.constant 0 : index
    %18 = vector.load %arg5[%c0_9, %c0_10] : memref<2x128xf32, #tpu.memory_space<vmem>>, vector<2x128xf32>
    tpu.vector_store %arg5[%c0_9, %c0_10], %17 {strides = array<i32>} : memref<2x128xf32, #tpu.memory_space<vmem>>, vector<2x128xf32>,
    return
  }
}

</mosaic_0001>

<bundles_post_ra>
// kernel: clip_regressor.1
= control target key start
LH: loop header
LB: loop body
LE: loop exit
PB: predicated region body
PF: predicated region fallthrough
CT: control target
= control target key end

     0   :  { %v24_v0 = vlaneseq  ;;  %v83_v1 = vmov 1983009808   ;;  %vm53_vm0 = vcmask 1041408   ;;  %vm55_vm1 = vcmask 517120   ;;  %s132_s2 = inlined_call_operand.vmem [shape: f32[1,192], index: 2, kind: input, shape index: {}]   ;;  %s133_s0 = inlined_call_operand.vmem [shape: f32[2,192], index: 0, kind: input, shape index: {}]   ;;  %s134_s1 = inlined_call_operand.vmem [shape: f32[2,128], index: 1, kind: input, shape index: {}]   ;;  %s135_s3 = inlined_call_operand.vmem [shape: f32[1,128], index: 3, kind: input, shape index: {}]   ;;  %s136_s4 = inlined_call_operand.<no memory space> [shape: f32[1], index: 4, kind: input, shape index: {}]   ;;  %s137_s5 = inlined_call_operand.vmem [shape: f32[2,128], index: 5, kind: output, shape index: {}]  }
   0x1   :  { %v34_v2 = vunpack.c.l.s4 %v83_v1  ;;  %v22_v4 = vld [vmem:[%s132_s2] sm:$0x3]  ;;  %v74_v25 = vstv %s136_s4 }
   0x2   :  { %v25_v3 = vshrl.u32 %v24_v0, 7  ;;  %v21_v12 = vld [vmem:[%s133_s0] sm:$0xf] }
   0x3   :  { %v35_v5 = vunpack.c.0.s8 %v34_v2  ;;  %v60_v16 = vld [vmem:[%s134_s1] sm:$0x3] }
   0x4   :  { %v26_v6 = vsub.s32 0, %v25_v3  ;;  %v30_v7 = vsub.s32 1, %v25_v3  ;;  %v81_v17 = vld [vmem:[%s135_s3] ss:$0 sm:$0xff] }
   0x5   :  { %v38_v10 = vsub.s32 %v35_v5, %v25_v3  ;;  %v68_v21 = vmul.f32 %v81_v17, %v60_v16 }
   0x6   :  { %v27_v8 = vrot.slane %v22_v4, %v26_v6  ;;  %v31_v9 = vrot.slane %v22_v4, %v30_v7 }
   0x7   :  { %v69_v23 = vsel %vm53_vm0, %v68_v21, 0.0 }
   0x8   :  { %v32_v11 = vcombine.low %v27_v8, %v31_v9 }
   0xa   :  { %v39_v13 = vrot.slane %v32_v11, %v38_v10 }
   0xc   :  { %v41_v14 = vmul.f32 %v39_v13, %v21_v12 }
   0xe   :  { %v49_v15 = vrot.slane %v41_v14, %v38_v10 }
  0x10   :  { %v50_v18 = vcombine.high %v49_v15, %v49_v15  ;;  %v54_v19 = vsel %vm53_vm0, %v49_v15, 0.0 }
  0x12   :  { %v56_v20 = vsel %vm55_vm1, %v50_v18, 0.0 }
  0x13   :  { %v57_v22 = vadd.f32 %v56_v20, %v54_v19 }
  0x15   :  { %58 = vadd.xlane.f32.xlu0 %v57_v22 }
  0x19   :  { %70 = vadd.xlane.f32.xlu0 %v69_v23 }
  0x9e   :  { %v59_v24 = vpop.xlane.xlu0 %58 }
  0xa2   :  { %v71_v26 = vpop.xlane.xlu0 %70 }
  0xa3   :  { %v72_v27 = vadd.f32 %v71_v26, %v59_v24 }
  0xa5   :  { %v75_v28 = vadd.f32 %v74_v25, %v72_v27 }
  0xa7   :  { %76 = vst [vmem:[%s137_s5] sm:$0x3] %v75_v28 }

</bundles_post_ra>
